<compile_context>
chip_gen: v5e
topology: v5e:2x2
jax: 0.10.0
libtpu: 0.0.40
codegen_flags: <defaults>
</compile_context>

<pallas_src>
import jax
import jax.numpy as jnp
from jax.experimental import pallas as pl
from jax.experimental.pallas import tpu as pltpu


def _round_up(x, m):
    return -(-x // m) * m


def _mlp_policy_kernel(z_ref, w1_ref, b1_ref, w2_ref, b2_ref, o_ref):
    # First linear (MXU) + bias + ReLU (VPU); accumulate in f32.
    h = jnp.dot(z_ref[...], w1_ref[...], preferred_element_type=jnp.float32)
    h = jnp.maximum(h + b1_ref[...], 0.0)            # (tb, HID_p) + (1, HID_p)
    # Second linear (MXU) + bias.  h is cast to the weight dtype for the MXU
    # (no-op for f32 weights; deliberate downcast if weights are bf16).
    out = jnp.dot(h.astype(w2_ref.dtype), w2_ref[...],
                  preferred_element_type=jnp.float32)
    o_ref[...] = (out + b2_ref[...]).astype(o_ref.dtype)


def pad_params(w1, b1, w2, b2, *, mxu_dtype=None):
    """One-time, lane-dense padding of the MLP head parameters.

    Call this once at init / parameter-load time and reuse the result for
    every forward call (hoists 4 zero-pad XLA ops off the per-call path).

    w1: [IN, HID]; b1: [1, HID]; w2: [HID, OUT]; b2: [1, OUT]
    (weights stored transposed relative to PyTorch's [out, in]).
    mxu_dtype: optional matmul-operand dtype (e.g. jnp.bfloat16).  Valid on
               v5e/v6e/v7x; biases stay f32.

    Returns ((w1_p, b1_p, w2_p, b2_p), out_dim).  Only the lane dims
    (HID, OUT) are padded to 128; IN (a sublane/K dim) is left as-is.
    """
    IN, HID = w1.shape
    OUT = w2.shape[1]
    HID_p = _round_up(HID, 128)
    OUT_p = _round_up(OUT, 128)
    w_dt = mxu_dtype if mxu_dtype is not None else w1.dtype
    w1_p = jnp.zeros((IN, HID_p), w_dt).at[:, :HID].set(w1.astype(w_dt))
    b1_p = jnp.zeros((1, HID_p), jnp.float32).at[:, :HID].set(
        b1.astype(jnp.float32))
    w2_p = jnp.zeros((HID_p, OUT_p), w_dt).at[:HID, :OUT].set(w2.astype(w_dt))
    b2_p = jnp.zeros((1, OUT_p), jnp.float32).at[:, :OUT].set(
        b2.astype(jnp.float32))
    return (w1_p, b1_p, w2_p, b2_p), OUT


def mlp_policy_forward(z, w1_p, b1_p, w2_p, b2_p, *, out_dim=None,
                       mxu_dtype=None, tb_max=512, unpad=True):
    """Fused MLP head: relu(z @ w1 + b1) @ w2 + b2.

    z: [B, IN] (unpadded); w*_p / b*_p: pre-padded params from `pad_params`
    (same mxu_dtype).  Zero padding of HID/OUT is exact for the math
    (relu(0)=0 and padded weight rows/cols are zero).

    out_dim: logical number of actions (for the output slice).  If None, or
             if unpad=False, the lane-padded output is returned and the
             consumer can index it directly (saves one XLA op per call).
    mxu_dtype: optional dtype (e.g. jnp.bfloat16) for the matmul operands —
               valid on v5e, v6e and v7x; biases / accumulation / ReLU are f32.
    """
    B, IN = z.shape
    IN_w, HID_p = w1_p.shape
    OUT_p = w2_p.shape[1]
    assert IN == IN_w, "z feature dim must match padded w1 first dim"
    out_dtype = z.dtype

    z_dt = mxu_dtype if mxu_dtype is not None else z.dtype
    two_byte = jnp.dtype(z_dt).itemsize == 2

    # Batch tiling.  bf16 packs 16 rows per vreg -> align tb to 16; f32 -> 8.
    row_align = 16 if two_byte else 8
    if B > tb_max:
        tb = tb_max                      # tb_max=512: multiple of 256 (MXU fill)
    else:
        tb = _round_up(B, row_align)
        # Once a single tile would reach 256 rows, split into >=2 grid steps so
        # v7x's second TensorCore gets work (no effect on 1-TC v5e/v6e).
        if tb >= 256:
            tb = _round_up(-(-tb // 2), row_align)
    B_p = _round_up(B, tb)
    grid = (B_p // tb,)

    # z: cast only if a narrower MXU dtype was requested; pad only the batch
    # dim, and only if needed (no-op for the common aligned-batch case).
    z_in = z.astype(z_dt) if z.dtype != z_dt else z
    if B_p != B:
        z_in = jnp.pad(z_in, ((0, B_p - B), (0, 0)))

    zi = jnp.dtype(z_dt).itemsize
    wi = jnp.dtype(w1_p.dtype).itemsize
    oi = jnp.dtype(out_dtype).itemsize

    # Advisory cost estimate (padded lane dims, real IN).
    flops = 2 * B_p * IN * HID_p + 2 * B_p * HID_p * OUT_p
    bytes_accessed = (B_p * IN * zi
                      + IN * HID_p * wi + HID_p * 4
                      + HID_p * OUT_p * wi + OUT_p * 4
                      + B_p * OUT_p * oi)
    cost = pl.CostEstimate(flops=flops, transcendentals=0,
                           bytes_accessed=bytes_accessed)

    # VMEM budget: streamed z/out blocks double-buffered; resident (constant
    # block index) weights/biases counted once with a small allowance for the
    # pipeline's second buffer; f32 intermediates for both matmul results.
    vmem_need = (2 * tb * IN * zi                      # z blocks (pipelined)
                 + 2 * tb * OUT_p * oi                 # out blocks (pipelined)
                 + 2 * (IN * HID_p + HID_p * OUT_p) * wi   # weights (resident)
                 + 2 * (HID_p + OUT_p) * 4             # biases
                 + tb * HID_p * 4 + tb * OUT_p * 4)    # f32 intermediates
    try:
        vmem_cap = int(pltpu.get_tpu_info().vmem_capacity_bytes)
    except Exception:
        vmem_cap = 64 * 1024 * 1024      # conservative: v7x per-TC capacity
    vmem_limit = min(vmem_cap,
                     max(int(1.25 * vmem_need) + (1 << 20), 16 * 1024 * 1024))

    out_p = pl.pallas_call(
        _mlp_policy_kernel,
        out_shape=jax.ShapeDtypeStruct((B_p, OUT_p), out_dtype),
        grid_spec=pltpu.PrefetchScalarGridSpec(
            num_scalar_prefetch=0,
            grid=grid,
            in_specs=[
                # z tiled over batch; last dim == full array dim (IN) is legal
                # even when IN is not a multiple of 128.
                pl.BlockSpec((tb, IN), lambda i: (i, 0)),
                # Weights/biases: constant block index -> DMA'd once and kept
                # resident by the pipeline.
                pl.BlockSpec((IN, HID_p), lambda i: (0, 0)),
                pl.BlockSpec((1, HID_p), lambda i: (0, 0)),
                pl.BlockSpec((HID_p, OUT_p), lambda i: (0, 0)),
                pl.BlockSpec((1, OUT_p), lambda i: (0, 0)),
            ],
            out_specs=pl.BlockSpec((tb, OUT_p), lambda i: (i, 0)),
        ),
        compiler_params=pltpu.CompilerParams(
            dimension_semantics=("parallel",),
            vmem_limit_bytes=int(vmem_limit)),
        cost_estimate=cost,
    )(z_in, w1_p, b1_p, w2_p, b2_p)

    if not unpad or out_dim is None:
        return out_p                      # consumer slices / indexes directly
    return out_p[:B, :out_dim]


def init_params(key, in_dim, hid_dim, out_dim):
    """Deterministic init mimicking PyTorch nn.Linear default (uniform +/- 1/sqrt(fan_in))."""
    k1, k2, k3, k4 = jax.random.split(key, 4)
    lim1 = 1.0 / jnp.sqrt(in_dim)
    lim2 = 1.0 / jnp.sqrt(hid_dim)
    w1 = jax.random.uniform(k1, (in_dim, hid_dim), jnp.float32, -lim1, lim1)
    b1 = jax.random.uniform(k2, (1, hid_dim), jnp.float32, -lim1, lim1)
    w2 = jax.random.uniform(k3, (hid_dim, out_dim), jnp.float32, -lim2, lim2)
    b2 = jax.random.uniform(k4, (1, out_dim), jnp.float32, -lim2, lim2)
    return w1, b1, w2, b2


if __name__ == "__main__":
    B, IN, HID, OUT = 16, 32, 64, 8  # small DQN head: obs_dim=32, hidden=64, n_actions=8

    key = jax.random.PRNGKey(0)
    kz, kp = jax.random.split(key)
    z = jax.random.normal(kz, (B, IN), jnp.float32)
    w1, b1, w2, b2 = init_params(kp, IN, HID, OUT)

    # One-time parameter padding (hoisted out of the per-call path).
    (w1_p, b1_p, w2_p, b2_p), out_dim = pad_params(w1, b1, w2, b2)

    # f32 MXU inputs here so the result matches the PyTorch-style f32 reference;
    # pass mxu_dtype=jnp.bfloat16 (to both pad_params and forward) on any
    # generation for the fast path.
    fwd = jax.jit(lambda zz: mlp_policy_forward(
        zz, w1_p, b1_p, w2_p, b2_p, out_dim=out_dim))
    out = jax.block_until_ready(fwd(z))

    # Pure-JAX reference check of the fused kernel.
    ref = jnp.maximum(z @ w1 + b1, 0.0) @ w2 + b2
    assert out.shape == (B, OUT)
    assert jnp.allclose(out, ref, atol=1e-5, rtol=1e-5)

    print("KERNEL_OK")
</pallas_src>

<mosaic_0001>
module attributes {stable_mosaic.version = 11 : i64} {
  func.func @_mlp_policy_kernel(%arg0: i32, %arg1: memref<16x32xf32, #tpu.memory_space<vmem>>, %arg2: memref<32x128xf32, #tpu.memory_space<vmem>>, %arg3: memref<1x128xf32, #tpu.memory_space<vmem>>, %arg4: memref<128x128xf32, #tpu.memory_space<vmem>>, %arg5: memref<1x128xf32, #tpu.memory_space<vmem>>, %arg6: memref<16x128xf32, #tpu.memory_space<vmem>>) attributes {dimension_semantics = [#tpu.dimension_semantics<parallel>], iteration_bounds = array<i64: 1>, scalar_prefetch = 0 : i64, scratch_operands = 0 : i64, tpu.core_type = #tpu.core_type<tc>, window_params = [{transform_indices = @transform_0, window_bounds = array<i64: 16, 32>}, {pipeline_mode = #tpu.pipeline_mode<synchronous>, transform_indices = @transform_1, window_bounds = array<i64: 32, 128>}, {pipeline_mode = #tpu.pipeline_mode<synchronous>, transform_indices = @transform_2, window_bounds = array<i64: 1, 128>}, {pipeline_mode = #tpu.pipeline_mode<synchronous>, transform_indices = @transform_3, window_bounds = array<i64: 128, 128>}, {pipeline_mode = #tpu.pipeline_mode<synchronous>, transform_indices = @transform_4, window_bounds = array<i64: 1, 128>}, {transform_indices = @transform_5, window_bounds = array<i64: 16, 128>}]} {
    %c0 = arith.constant 0 : index
    %c0_0 = arith.constant 0 : index
    %0 = vector.load %arg1[%c0, %c0_0] : memref<16x32xf32, #tpu.memory_space<vmem>>, vector<16x32xf32>
    %c0_1 = arith.constant 0 : index
    %c0_2 = arith.constant 0 : index
    %1 = vector.load %arg2[%c0_1, %c0_2] : memref<32x128xf32, #tpu.memory_space<vmem>>, vector<32x128xf32>
    %cst = arith.constant dense<0.000000e+00> : vector<16x128xf32>
    %2 = tpu.matmul %0, %1, %cst {dimension_numbers = #tpu.dot_dimension_numbers<[1], [0], [0], [1], [0, 0, 1, 1], [], []>} : vector<16x32xf32>, vector<32x128xf32>, vector<16x128xf32> -> vector<16x128xf32>
    %c0_3 = arith.constant 0 : index
    %c0_4 = arith.constant 0 : index
    %3 = vector.load %arg3[%c0_3, %c0_4] : memref<1x128xf32, #tpu.memory_space<vmem>>, vector<1x128xf32>
    %4 = vector.broadcast %3 : vector<1x128xf32> to vector<16x128xf32>
    %5 = arith.addf %2, %4 : vector<16x128xf32>
    %cst_5 = arith.constant 0.000000e+00 : f32
    %6 = vector.broadcast %cst_5 : f32 to vector<16x128xf32>
    %7 = arith.maximumf %5, %6 : vector<16x128xf32>
    %c0_6 = arith.constant 0 : index
    %c0_7 = arith.constant 0 : index
    %8 = vector.load %arg4[%c0_6, %c0_7] : memref<128x128xf32, #tpu.memory_space<vmem>>, vector<128x128xf32>
    %cst_8 = arith.constant dense<0.000000e+00> : vector<16x128xf32>
    %9 = tpu.matmul %7, %8, %cst_8 {dimension_numbers = #tpu.dot_dimension_numbers<[1], [0], [0], [1], [0, 0, 1, 1], [], []>} : vector<16x128xf32>, vector<128x128xf32>, vector<16x128xf32> -> vector<16x128xf32>
    %c0_9 = arith.constant 0 : index
    %c0_10 = arith.constant 0 : index
    %10 = vector.load %arg5[%c0_9, %c0_10] : memref<1x128xf32, #tpu.memory_space<vmem>>, vector<1x128xf32>
    %11 = vector.broadcast %10 : vector<1x128xf32> to vector<16x128xf32>
    %12 = arith.addf %9, %11 : vector<16x128xf32>
    %c0_11 = arith.constant 0 : index
    %c0_12 = arith.constant 0 : index
    %13 = vector.load %arg6[%c0_11, %c0_12] : memref<16x128xf32, #tpu.memory_space<vmem>>, vector<16x128xf32>
    tpu.vector_store %arg6[%c0_11, %c0_12], %12 {strides = array<i32>} : memref<16x128xf32, #tpu.memory_space<vmem>>, vector<16x128xf32>,
    return
  }
  func.func @transform_0(%arg0: i32) -> (i32, i32) {
    %c0_i32 = arith.constant 0 : i32
    %c0_i32_0 = arith.constant 0 : i32
    return %arg0, %c0_i32 : i32, i32
  }
  func.func @transform_1(%arg0: i32) -> (i32, i32) {
    %c0_i32 = arith.constant 0 : i32
    %c0_i32_0 = arith.constant 0 : i32
    %c0_i32_1 = arith.constant 0 : i32
    return %c0_i32, %c0_i32_0 : i32, i32
  }
  func.func @transform_2(%arg0: i32) -> (i32, i32) {
    %c0_i32 = arith.constant 0 : i32
    %c0_i32_0 = arith.constant 0 : i32
    %c0_i32_1 = arith.constant 0 : i32
    return %c0_i32, %c0_i32_0 : i32, i32
  }
  func.func @transform_3(%arg0: i32) -> (i32, i32) {
    %c0_i32 = arith.constant 0 : i32
    %c0_i32_0 = arith.constant 0 : i32
    %c0_i32_1 = arith.constant 0 : i32
    return %c0_i32, %c0_i32_0 : i32, i32
  }
  func.func @transform_4(%arg0: i32) -> (i32, i32) {
    %c0_i32 = arith.constant 0 : i32
    %c0_i32_0 = arith.constant 0 : i32
    %c0_i32_1 = arith.constant 0 : i32
    return %c0_i32, %c0_i32_0 : i32, i32
  }
  func.func @transform_5(%arg0: i32) -> (i32, i32) {
    %c0_i32 = arith.constant 0 : i32
    %c0_i32_0 = arith.constant 0 : i32
    return %arg0, %c0_i32 : i32, i32
  }
}

</mosaic_0001>

<bundles_post_ra>
// kernel: _lambda_.1
= control target key start
LH: loop header
LB: loop body
LE: loop exit
PB: predicated region body
PF: predicated region fallthrough
CT: control target
= control target key end

     0   :  { %10 = vsyncpa [#allocation3], 0  ;;  %s362_s0 = inlined_call_operand.hbm [shape: f32[16,32], index: 0, kind: input, shape index: {}]   ;;  %s363_s1 = inlined_call_operand.hbm [shape: f32[32,128], index: 1, kind: input, shape index: {}]   ;;  %s364_s2 = inlined_call_operand.hbm [shape: f32[1,128], index: 2, kind: input, shape index: {}]   ;;  %s365_s3 = inlined_call_operand.hbm [shape: f32[128,128], index: 3, kind: input, shape index: {}]   ;;  %s366_s4 = inlined_call_operand.vmem [shape: f32[1,128], index: 4, kind: input, shape index: {}]   ;;  %s367_s5 = inlined_call_operand.vmem [shape: f32[16,128], index: 5, kind: output, shape index: {}]  }
   0x1   :  { %11 = vsyncpa [#allocation5], 0 }
   0x2   :  { %12 = vsyncpa [#allocation8], 0  ;;  %s30_s20 = sshll.u32 %s363_s1, 4  ;;  %s303_s21 = smov [#allocation4]   ;;  %s31_s20 = int_to_ptr.hbm [resolvable:$true] %s30_s20 }
   0x3   :  { %s32_s22 = sshll.u32 %s303_s21, 4  ;;  %s17_s25 = sshll.u32 %s362_s0, 4  ;;  %s33_s22 = int_to_ptr.vmem [resolvable:$true] %s32_s22  ;;  %s18_s25 = int_to_ptr.hbm [resolvable:$true] %s17_s25 }
   0x4   :  { %s304_s26 = smov 128   ;;  %s305_s27 = smov 8  }
   0x5   :  { %38 = dma.hbm_to_vmem [thread:$0]  %s31_s20, 512, %s33_s22, [#allocation5], %s304_s26, %s304_s26, %s305_s27  }
   0x6   :  { %s306_s28 = smov [#allocation2]   ;;  %s44_s7 = sshll.u32 %s364_s2, 4  ;;  %s45_s7 = int_to_ptr.hbm [resolvable:$true] %s44_s7 }
   0x7   :  { %s19_s29 = sshll.u32 %s306_s28, 4  ;;  %s54_s9 = sshll.u32 %s365_s3, 4  ;;  %s20_s29 = int_to_ptr.vmem [resolvable:$true] %s19_s29  ;;  %s55_s9 = int_to_ptr.hbm [resolvable:$true] %s54_s9 }
   0x8   :  { %25 = dma.hbm_to_vmem [thread:$0]  %s18_s25, 256, %s20_s29, [#allocation3], %s304_s26, %s304_s26, %s305_s27  }
   0x9   :  { %s307_s10 = smov [#allocation6]   ;;  %s308_s0 = smov [#allocation7]  }
   0xa   :  { %s46_s11 = sshll.u32 %s307_s10, 4  ;;  %s56_s12 = sshll.u32 %s308_s0, 4  ;;  %s47_s11 = int_to_ptr.vmem [resolvable:$true] %s46_s11  ;;  %s57_s12 = int_to_ptr.vmem [resolvable:$true] %s56_s12 }
   0xb   :  { %49 = dma.hbm_to_vmem [thread:$0]  %s45_s7, 16, %s47_s11, [#allocation5]  }
   0xc   :  { %62 = dma.hbm_to_vmem [thread:$0]  %s55_s9, 2048, %s57_s12, [#allocation8], %s304_s26, %s304_s26, %s305_s27  }
   0xd   :  { %297 = dma.done.wait [#allocation3], 256  }
   0xe   :  { %298 = vsyncadd [#allocation3], 4294967040 }
   0xf   :  { %299 = dma.done.wait [#allocation5], 528  }
  0x10   :  { %300 = vsyncadd [#allocation5], 4294966768 }
  0x11   :  { %301 = dma.done.wait [#allocation8], 2048  }
  0x12   :  { %302 = vsyncadd [#allocation8], 4294965248  ;;  %v86_v0 = vld [vmem:[#allocation4 + $0x18] sm:$0xff]  ;;  %v85_v1 = vld [vmem:[#allocation4 + $0x10] sm:$0xff]  ;;  %vm91_vm0 = vcmask 261120  }
  0x13   :  { %110 = vmatpush.msra.mxu0 %v86_v0  ;;  %v84_v2 = vld [vmem:[#allocation4 + $0x8] sm:$0xff]  ;;  %v138_v3 = vld [vmem:[#allocation7 + $0x78] sm:$0xff]  ;;  %v137_v4 = vld [vmem:[#allocation7 + $0x70] sm:$0xff] }
  0x14   :  { %143 = vmatpush.msra.mxu1 %v138_v3  ;;  %v83_v5 = vld [vmem:[#allocation4] sm:$0xff]  ;;  %v136_v6 = vld [vmem:[#allocation7 + $0x68] sm:$0xff]  ;;  %177 = vmatpush.msra.mxu2 %v138_v3  ;;  %v133_v10 = vld [vmem:[#allocation7 + $0x50] sm:$0xff] }
  0x15   :  { %111 = vmatpush.msra.mxu0 %v85_v1  ;;  %v81_v7 = vld [vmem:[#allocation2] sm:$0xff]  ;;  %v135_v8 = vld [vmem:[#allocation7 + $0x60] sm:$0xff]  ;;  %v134_v9 = vld [vmem:[#allocation7 + $0x58] sm:$0xff] }
  0x16   :  { %144 = vmatpush.msra.mxu1 %v137_v4  ;;  %178 = vmatpush.msra.mxu2 %v137_v4  ;;  %v132_v11 = vld [vmem:[#allocation7 + $0x48] sm:$0xff]  ;;  %v82_v12 = vld [vmem:[#allocation2 + $0x8] sm:$0xff]  ;;  %v131_v13 = vld [vmem:[#allocation7 + $0x40] sm:$0xff] }
  0x17   :  { %112 = vmatpush.msra.mxu0 %v84_v2  ;;  %v130_v14 = vld [vmem:[#allocation7 + $0x38] sm:$0xff]  ;;  %v129_v15 = vld [vmem:[#allocation7 + $0x30] sm:$0xff]  ;;  %v128_v16 = vld [vmem:[#allocation7 + $0x28] sm:$0xff] }
  0x18   :  { %145 = vmatpush.msra.mxu1 %v136_v6  ;;  %179 = vmatpush.msra.mxu2 %v136_v6  ;;  %v127_v17 = vld [vmem:[#allocation7 + $0x20] sm:$0xff]  ;;  %v126_v18 = vld [vmem:[#allocation7 + $0x18] sm:$0xff]  ;;  %v125_v19 = vld [vmem:[#allocation7 + $0x10] sm:$0xff] }
  0x19   :  { %113 = vmatpush.msra.mxu0 %v83_v5  ;;  %v124_v20 = vld [vmem:[#allocation7 + $0x8] sm:$0xff]  ;;  %v123_v21 = vld [vmem:[#allocation7] sm:$0xff]  ;;  %v199_v22 = vld [vmem:[#allocation6] ss:$0 sm:$0xff] }
  0x1a   :  { %175 = vmatmul.msk.f32.vlgmr.msra.gmra.mxu0 %vm91_vm0, %v81_v7  ;;  %146 = vmatpush.msra.mxu1 %v135_v8  ;;  %v200_v29 = vld [vmem:[%s366_s4] ss:$0 sm:$0xff] }
  0x1b   :  { %180 = vmatpush.msra.mxu2 %v135_v8 }
  0x1c   :  { %147 = vmatpush.msra.mxu1 %v134_v9 }
  0x1d   :  { %181 = vmatpush.msra.mxu2 %v134_v9 }
  0x1e   :  { %148 = vmatpush.msra.mxu1 %v133_v10 }
  0x1f   :  { %182 = vmatpush.msra.mxu2 %v133_v10 }
  0x20   :  { %149 = vmatpush.msra.mxu1 %v132_v11 }
  0x21   :  { %183 = vmatpush.msra.mxu2 %v132_v11 }
  0x22   :  { %176 = vmatmul.msk.f32.gmra.mxu0 %vm91_vm0, %v82_v12  ;;  %150 = vmatpush.msra.mxu1 %v131_v13 }
  0x23   :  { %184 = vmatpush.msra.mxu2 %v131_v13 }
  0x24   :  { %151 = vmatpush.msra.mxu1 %v130_v14 }
  0x25   :  { %185 = vmatpush.msra.mxu2 %v130_v14 }
  0x26   :  { %152 = vmatpush.msra.mxu1 %v129_v15 }
  0x27   :  { %186 = vmatpush.msra.mxu2 %v129_v15 }
  0x28   :  { %153 = vmatpush.msra.mxu1 %v128_v16 }
  0x29   :  { %187 = vmatpush.msra.mxu2 %v128_v16 }
  0x2a   :  { %154 = vmatpush.msra.mxu1 %v127_v17 }
  0x2b   :  { %188 = vmatpush.msra.mxu2 %v127_v17 }
  0x2c   :  { %155 = vmatpush.msra.mxu1 %v126_v18 }
  0x2d   :  { %189 = vmatpush.msra.mxu2 %v126_v18 }
  0x2e   :  { %156 = vmatpush.msra.mxu1 %v125_v19 }
  0x2f   :  { %190 = vmatpush.msra.mxu2 %v125_v19 }
  0x30   :  { %157 = vmatpush.msra.mxu1 %v124_v20 }
  0x31   :  { %191 = vmatpush.msra.mxu2 %v124_v20 }
  0x32   :  { %158 = vmatpush.msra.mxu1 %v123_v21 }
  0x33   :  { %192 = vmatpush.msra.mxu2 %v123_v21 }
  0x97   :  { %v115_v23 = vpop.f32.mrf.mxu0 }
  0x98   :  { %v116_v24 = vadd.f32 %v199_v22, %v115_v23 }
  0x9a   :  { %v121_v25 = vmax.f32 %v116_v24, 0.0 }
  0x9c   :  { %159 = vmatmul.f32.vlgmr.msra.gmra.mxu1 %v121_v25 }
  0x9f   :  { %v118_v26 = vpop.f32.mrf.mxu0 }
  0xa0   :  { %v119_v27 = vadd.f32 %v199_v22, %v118_v26 }
  0xa2   :  { %v122_v28 = vmax.f32 %v119_v27, 0.0 }
  0xa4   :  { %162 = vmatmul.f32.vlgmr.msra.gmra.mxu2 %v122_v28 }
 0x119   :  { %v160_v30 = vpop.f32.mrf.mxu1 }
 0x11a   :  { %v161_v31 = vadd.f32 %v200_v29, %v160_v30 }
 0x11c   :  { %166 = vst [vmem:[%s367_s5] sm:$0xff] %v161_v31 }
 0x127   :  { %v163_v32 = vpop.f32.mrf.mxu2 }
 0x128   :  { %v164_v33 = vadd.f32 %v200_v29, %v163_v32 }
 0x12a   :  { %167 = vst [vmem:[%s367_s5 + $0x8] sm:$0xff] %v164_v33 }
 0x12b   :  { %172 = vsyncpa [#allocation3], 1 }
 0x12c   :  { %173 = vsyncpa [#allocation5], 1 }
 0x12d   :  { %174 = vsyncpa [#allocation8], 1 }

</bundles_post_ra>
